<compile_context>
chip_gen: v7x
topology: tpu7x:2x2x1
jax: 0.10.0
libtpu: 0.0.40
codegen_flags: <defaults>
</compile_context>

<pallas_src>
import functools

import jax
import jax.numpy as jnp
from jax import lax
from jax.experimental import pallas as pl
from jax.experimental.pallas import tpu as pltpu


def _round_up(x, m):
    return ((x + m - 1) // m) * m


def _pick_tile(dim, cap):
    """Largest 128-aligned divisor of `dim` that is <= cap (or the full dim)."""
    cap = max(128, min(cap, dim))
    if dim <= cap:
        return dim
    t = (cap // 128) * 128
    while t > 128 and dim % t != 0:
        t -= 128
    return t if dim % t == 0 else dim


def _pick_batch_block(B, S, H):
    """Largest batch block such that the resident bf16 hidden slab stays under
    ~8 MiB (double-buffered) and, when B >= 2, at least two batch steps remain
    so the v7x 2-TC 'parallel' split has work for both cores."""
    budget_rows = max(1, (8 << 20) // max(1, 2 * S * H * 2))
    best = 1
    for cand in range(1, B + 1):
        if B % cand or cand > budget_rows:
            continue
        if cand != B and (cand * S) % 8 != 0:
            continue
        if B >= 2 and B // cand < 2:
            continue
        best = cand
    return best


# ---------------------------------------------------------------------------
# Fused kernel: LM-head matmul + online-logsumexp cloze scoring.
#
# Per grid step (b, j, k):
#   acc[:, :]  (+)= hidden[b-block, k-slab] @ w_out[k-tile, j-tile]  (MXU, f32)
#   at k == last:  fold the logits tile into the running (m, l) logsumexp state
#                  and accumulate picked[bb, c, s] += logits[s, tgt[bb,c,s]]
#                  for targets that fall inside this vocab tile.
#   at (j, k) == last: score[bb, c] = sum_s mask[bb,c,s] * (picked - lse)
# ---------------------------------------------------------------------------
def _fused_cloze_kernel(hid_ref, w_ref, tgt_ref, mask_ref, out_ref,
                        acc_ref, m_ref, l_ref, picked_ref,
                        *, length_penalty, vocab_tile, hidden_tile,
                        batch_block, seq_len, num_choices):
    j = pl.program_id(1)            # vocab-tile index
    k = pl.program_id(2)            # hidden (contraction) tile index
    nj = pl.num_programs(1)
    nk = pl.num_programs(2)

    # ---- per-batch-block init of the running softmax / gather state ---------
    @pl.when((j == 0) & (k == 0))
    def _():
        m_ref[...] = jnp.full_like(m_ref, -jnp.inf)
        l_ref[...] = jnp.zeros_like(l_ref)
        picked_ref[...] = jnp.zeros_like(picked_ref)

    # ---- K-tiled matmul: hidden is VMEM-resident, slice the k slab ----------
    k_start = k * hidden_tile
    if hidden_tile % 128 == 0:
        k_start = pl.multiple_of(k_start, 128)
    hid_tile = hid_ref[:, pl.ds(k_start, hidden_tile)]            # (bB*S, tk) bf16
    part = jnp.dot(hid_tile, w_ref[...],
                   preferred_element_type=jnp.float32)            # (bB*S, tv) f32

    @pl.when(k == 0)
    def _():                        # first K step writes directly (no zero+add)
        acc_ref[...] = part

    @pl.when(k != 0)
    def _():
        acc_ref[...] += part

    # ---- logits tile complete: fold into online logsumexp + picked gather ---
    @pl.when(k == nk - 1)
    def _():
        logits = acc_ref[...]                                      # (bB*S, tv)

        # online logsumexp over the vocab axis
        tile_max = jnp.max(logits, axis=-1, keepdims=True)         # (bB*S, 1)
        m_new = jnp.maximum(m_ref[...], tile_max)
        l_ref[...] = (l_ref[...] * jnp.exp(m_ref[...] - m_new)
                      + jnp.sum(jnp.exp(logits - m_new), axis=-1, keepdims=True))
        m_ref[...] = m_new

        # Select-and-reduce gather of logits[s, tgt[bb,c,s]] restricted to this
        # vocab tile (each target id lies in exactly one tile).  Unrolled over
        # (bb, c): the live intermediate is only (S, tv); one small transpose
        # of the (C, S) targets per batch row puts them on the sublane axis.
        base = j * vocab_tile
        iota_v = lax.broadcasted_iota(jnp.int32, (1, vocab_tile), 1)  # (1, tv)
        tgt_local = tgt_ref[...] - base                               # (bB, C, S)
        for bb in range(batch_block):
            row_logits = logits[bb * seq_len:(bb + 1) * seq_len, :]   # (S, tv)
            tgt_bb = jnp.transpose(tgt_local[bb])                     # (S, C)
            for c in range(num_choices):
                sel = tgt_bb[:, c:c + 1] == iota_v                    # (S, tv)
                picked_ref[bb, c, :] += jnp.sum(
                    jnp.where(sel, row_logits, 0.0), axis=-1)         # (S,)

        # ---- finalize the per-batch-row scores on the last vocab tile -------
        @pl.when(j == nj - 1)
        def _():
            lse_col = m_ref[...] + jnp.log(l_ref[...])                # (bB*S, 1)
            for bb in range(batch_block):
                lse_row = jnp.transpose(
                    lse_col[bb * seq_len:(bb + 1) * seq_len, :])      # (1, S)
                mask_bb = mask_ref[bb]                                # (C, S)
                logp = picked_ref[bb] - lse_row                       # (C, S)
                score = jnp.sum(mask_bb * logp, axis=-1)              # (C,)
                if length_penalty > 0.0:
                    # NaN guard: all-zero mask rows divide by 1, not 0.
                    denom = jnp.maximum(jnp.sum(mask_bb, axis=-1), 1.0)
                    score = score / jnp.exp(length_penalty * jnp.log(denom))
                out_ref[bb] = score


def multi_token_cloze_fast_scores(hidden, w_out, target_ids, logit_mask,
                                  take_softmax=False, length_penalty=0.0,
                                  *, vocab_tile=512, hidden_tile=512,
                                  batch_block=None):
    """Fused LM-head + cloze scoring.  hidden: (B,S,H), w_out: (H,V)."""
    # take_softmax is a mathematical no-op for the returned scores:
    # CE(log_softmax(x)) == CE(x) since logsumexp(log_softmax(x)) == 0.
    del take_softmax

    B, S, H = hidden.shape
    V = w_out.shape[-1]
    C = target_ids.shape[1]
    assert w_out.shape == (H, V)
    assert target_ids.shape == (B, C, S) and logit_mask.shape == (B, C, S)

    tv = _pick_tile(V, vocab_tile)
    tk = _pick_tile(H, hidden_tile)
    assert V % tv == 0 and H % tk == 0

    bB = batch_block if batch_block is not None else _pick_batch_block(B, S, H)
    assert B % bB == 0, (B, bB)
    assert (bB * S) % 8 == 0 or bB == B, (
        "batch_block * seq_len must be a multiple of 8 (sublane tiling)")

    # bf16 operands for the MXU (no-op if the caller pre-cast at setup time).
    if hidden.dtype != jnp.bfloat16:
        hidden = hidden.astype(jnp.bfloat16)
    if w_out.dtype != jnp.bfloat16:
        w_out = w_out.astype(jnp.bfloat16)
    hidden2d = hidden.reshape(B * S, H)          # free row-major reshape

    kernel = functools.partial(
        _fused_cloze_kernel,
        length_penalty=float(length_penalty), vocab_tile=tv, hidden_tile=tk,
        batch_block=bB, seq_len=S, num_choices=C)

    # VMEM footprint (padded to the (8, 128) vreg tiling) -> explicit limit,
    # capped at v7x's 64 MiB physical budget.
    bs = bB * S
    vmem_needed = (
        2 * _round_up(bs, 8) * _round_up(H, 128) * 2            # resident hidden
        + 2 * _round_up(tk, 8) * _round_up(tv, 128) * 2         # w tiles (dbl-buf)
        + 2 * 2 * bB * _round_up(C, 8) * _round_up(S, 128) * 4  # targets + mask
        + 2 * _round_up(bB, 8) * _round_up(C, 128) * 4          # out block
        + _round_up(bs, 8) * _round_up(tv, 128) * 4             # acc
        + 2 * _round_up(bs, 8) * 128 * 4                        # m, l
        + bB * _round_up(C, 8) * _round_up(S, 128) * 4)         # picked
    vmem_limit = min(max(int(vmem_needed * 1.25) + (2 << 20), 32 << 20), 64 << 20)

    cost = pl.CostEstimate(
        flops=2 * B * S * H * V + 2 * B * C * S * V,
        transcendentals=B * S * V,
        bytes_accessed=(B * S * H * 2            # hidden streamed once
                        + (B // bB) * H * V * 2  # weights once per batch block
                        + B * C * S * 8          # targets + mask
                        + B * C * 4))            # scores

    return pl.pallas_call(
        kernel,
        out_shape=jax.ShapeDtypeStruct((B, C), jnp.float32),
        grid_spec=pltpu.PrefetchScalarGridSpec(
            num_scalar_prefetch=0,
            grid=(B // bB, V // tv, H // tk),
            in_specs=[
                pl.BlockSpec((bB * S, H), lambda b, j, k: (b, 0)),    # hidden (resident)
                pl.BlockSpec((tk, tv), lambda b, j, k: (k, j)),       # w_out
                pl.BlockSpec((bB, C, S), lambda b, j, k: (b, 0, 0)),  # targets
                pl.BlockSpec((bB, C, S), lambda b, j, k: (b, 0, 0)),  # mask
            ],
            out_specs=pl.BlockSpec((bB, C), lambda b, j, k: (b, 0)),
            scratch_shapes=[
                pltpu.VMEM((bB * S, tv), jnp.float32),   # logits-tile accumulator
                pltpu.VMEM((bB * S, 1), jnp.float32),    # running max  m
                pltpu.VMEM((bB * S, 1), jnp.float32),    # running sum  l
                pltpu.VMEM((bB, C, S), jnp.float32),     # picked-logit accumulator
            ],
        ),
        compiler_params=pltpu.CompilerParams(
            dimension_semantics=("parallel", "arbitrary", "arbitrary"),
            vmem_limit_bytes=vmem_limit),
        cost_estimate=cost,
    )(hidden2d, w_out, target_ids.astype(jnp.int32),
      logit_mask.astype(jnp.float32))


# ---------------------------------------------------------------------------
# Full forward: synthetic GLM backbone (glue) + fused Pallas kernel.
# ---------------------------------------------------------------------------
def glm_multi_token_cloze_fast_forward(params, input_ids, position_ids,
                                       attention_mask, target_ids, logit_mask,
                                       take_softmax=False, length_penalty=0.0,
                                       **tile_kwargs):
    del attention_mask  # unused by the synthetic backbone
    tok_emb, pos_emb, w_out = params            # w_out pre-cast to bf16 at setup
    hidden = (tok_emb[input_ids] + pos_emb[position_ids]).astype(jnp.bfloat16)
    return multi_token_cloze_fast_scores(
        hidden, w_out, target_ids, logit_mask,
        take_softmax=take_softmax, length_penalty=length_penalty, **tile_kwargs)


# ---------------------------------------------------------------------------
# Pure-JAX reference (same bf16 MXU feeding, f32 math) for validation.
# ---------------------------------------------------------------------------
def _reference(params, input_ids, position_ids, target_ids, logit_mask,
               length_penalty=0.0):
    tok_emb, pos_emb, w_out = params
    hidden = (tok_emb[input_ids] + pos_emb[position_ids]).astype(jnp.bfloat16)
    logits = jnp.einsum("bsh,hv->bsv", hidden, w_out.astype(jnp.bfloat16),
                        preferred_element_type=jnp.float32)
    logp = jax.nn.log_softmax(logits, axis=-1)                # (B, S, V)
    B, C, S = target_ids.shape
    logp_rep = jnp.repeat(logp, C, axis=0)                    # (B*C, S, V)
    tgt = target_ids.reshape(B * C, S)
    mask = logit_mask.reshape(B * C, S).astype(jnp.float32)
    picked = jnp.take_along_axis(logp_rep, tgt[:, :, None], axis=-1)[..., 0]
    score = (picked * mask).sum(axis=1)
    if length_penalty > 0.0:
        score = score / jnp.maximum(mask.sum(axis=1), 1.0) ** length_penalty
    return score.reshape(B, C)


if __name__ == "__main__":
    # Small shapes, 128-aligned; two calls exercise both the batch-blocked
    # single-tile path and the multi-tile (online LSE + K accumulation) path.
    B, S, H, V, C = 2, 8, 256, 256, 3

    key = jax.random.PRNGKey(0)
    k1, k2, k3, k4, k5, k6 = jax.random.split(key, 6)

    tok_emb = jax.random.normal(k1, (V, H), jnp.float32) * 0.05
    pos_emb = jax.random.normal(k2, (S, H), jnp.float32) * 0.05
    # Pre-cast the LM-head weights to bf16 ONCE at setup time.
    w_out = (jax.random.normal(k3, (H, V), jnp.float32) * 0.05).astype(jnp.bfloat16)
    params = (tok_emb, pos_emb, w_out)

    input_ids = jax.random.randint(k4, (B, S), 0, V)
    position_ids = jnp.tile(jnp.arange(S, dtype=jnp.int32)[None, :], (B, 1))
    attention_mask = jnp.ones((B, 1, S, S), jnp.float32)      # unused (synthetic)
    target_ids = jax.random.randint(k5, (B, C, S), 0, V)
    logit_mask = (jax.random.uniform(k6, (B, C, S)) > 0.4).astype(jnp.float32)

    ref = _reference(params, input_ids, position_ids, target_ids, logit_mask)

    # (1) Default (large) tiles + batch blocking (both rows share one weight
    #     stream; MXU M = bB*S).
    scores = glm_multi_token_cloze_fast_forward(
        params, input_ids, position_ids, attention_mask, target_ids,
        logit_mask, take_softmax=False, length_penalty=0.0, batch_block=2)
    scores = jax.block_until_ready(scores)
    assert scores.shape == (B, C)
    assert jnp.allclose(scores, ref, atol=2e-3, rtol=2e-3), (scores, ref)

    # (2) Forced small tiles -> grid (2, 2, 2): exercises the online-logsumexp
    #     fold across vocab tiles and the K-tiled accumulator, plus the
    #     take_softmax no-op and the NaN-guarded length_penalty path.
    ref_lp = _reference(params, input_ids, position_ids, target_ids,
                        logit_mask, length_penalty=1.0)
    scores_lp = glm_multi_token_cloze_fast_forward(
        params, input_ids, position_ids, attention_mask, target_ids,
        logit_mask, take_softmax=True, length_penalty=1.0,
        vocab_tile=128, hidden_tile=128, batch_block=1)
    scores_lp = jax.block_until_ready(scores_lp)
    assert jnp.allclose(scores_lp, ref_lp, atol=2e-3, rtol=2e-3), (scores_lp, ref_lp)

    print("KERNEL_OK")
</pallas_src>

<mosaic_0001>
module attributes {stable_mosaic.version = 11 : i64} {
  func.func @_fused_cloze_kernel(%arg0: i32, %arg1: i32, %arg2: i32, %arg3: memref<16x256xbf16, #tpu.memory_space<vmem>>, %arg4: memref<256x256xbf16, #tpu.memory_space<vmem>>, %arg5: memref<2x3x8xi32, #tpu.memory_space<vmem>>, %arg6: memref<2x3x8xf32, #tpu.memory_space<vmem>>, %arg7: memref<2x3xf32, #tpu.memory_space<vmem>>, %arg8: memref<16x256xf32, #tpu.memory_space<vmem>>, %arg9: memref<16x1xf32, #tpu.memory_space<vmem>>, %arg10: memref<16x1xf32, #tpu.memory_space<vmem>>, %arg11: memref<2x3x8xf32, #tpu.memory_space<vmem>>) attributes {dimension_semantics = [#tpu.dimension_semantics<parallel>, #tpu.dimension_semantics<arbitrary>, #tpu.dimension_semantics<arbitrary>], iteration_bounds = array<i64: 1, 1, 1>, scalar_prefetch = 0 : i64, scratch_operands = 4 : i64, tpu.core_type = #tpu.core_type<tc>, window_params = [{transform_indices = @transform_0, window_bounds = array<i64: 16, 256>}, {transform_indices = @transform_1, window_bounds = array<i64: 256, 256>}, {transform_indices = @transform_2, window_bounds = array<i64: 2, 3, 8>}, {transform_indices = @transform_3, window_bounds = array<i64: 2, 3, 8>}, {transform_indices = @transform_4, window_bounds = array<i64: 2, 3>}]} {
    %c0_i32 = arith.constant 0 : i32
    %0 = arith.cmpi eq, %arg1, %c0_i32 : i32
    %c0_i32_0 = arith.constant 0 : i32
    %1 = arith.cmpi eq, %arg2, %c0_i32_0 : i32
    %2 = arith.andi %0, %1 : i1
    %3 = arith.extui %2 : i1 to i32
    %c0_i32_1 = arith.constant 0 : i32
    %4 = arith.cmpi ne, %3, %c0_i32_1 : i32
    scf.if %4 {
      %cst_10 = arith.constant 0xFF800000 : f32
      %20 = vector.broadcast %cst_10 : f32 to vector<16x1xf32>
      %c0_11 = arith.constant 0 : index
      %c0_12 = arith.constant 0 : index
      %21 = vector.load %arg9[%c0_11, %c0_12] : memref<16x1xf32, #tpu.memory_space<vmem>>, vector<16x1xf32>
      tpu.vector_store %arg9[%c0_11, %c0_12], %20 {strides = array<i32>} : memref<16x1xf32, #tpu.memory_space<vmem>>, vector<16x1xf32>,
      %cst_13 = arith.constant 0.000000e+00 : f32
      %22 = vector.broadcast %cst_13 : f32 to vector<16x1xf32>
      %c0_14 = arith.constant 0 : index
      %c0_15 = arith.constant 0 : index
      %23 = vector.load %arg10[%c0_14, %c0_15] : memref<16x1xf32, #tpu.memory_space<vmem>>, vector<16x1xf32>
      tpu.vector_store %arg10[%c0_14, %c0_15], %22 {strides = array<i32>} : memref<16x1xf32, #tpu.memory_space<vmem>>, vector<16x1xf32>,
      %cst_16 = arith.constant 0.000000e+00 : f32
      %24 = vector.broadcast %cst_16 : f32 to vector<2x3x8xf32>
      %c0_17 = arith.constant 0 : index
      %c0_18 = arith.constant 0 : index
      %c0_19 = arith.constant 0 : index
      %25 = vector.load %arg11[%c0_17, %c0_18, %c0_19] : memref<2x3x8xf32, #tpu.memory_space<vmem>>, vector<2x3x8xf32>
      tpu.vector_store %arg11[%c0_17, %c0_18, %c0_19], %24 {strides = array<i32>} : memref<2x3x8xf32, #tpu.memory_space<vmem>>, vector<2x3x8xf32>,
    } else {
    }
    %c256_i32 = arith.constant 256 : i32
    %5 = arith.muli %arg2, %c256_i32 : i32
    %6 = tpu.assume_multiple %5, 128 : i32
    %c0 = arith.constant 0 : index
    %7 = arith.index_cast %6 : i32 to index
    %8 = vector.load %arg3[%c0, %7] : memref<16x256xbf16, #tpu.memory_space<vmem>>, vector<16x256xbf16>
    %c0_2 = arith.constant 0 : index
    %c0_3 = arith.constant 0 : index
    %9 = vector.load %arg4[%c0_2, %c0_3] : memref<256x256xbf16, #tpu.memory_space<vmem>>, vector<256x256xbf16>
    %cst = arith.constant dense<0.000000e+00> : vector<16x256xf32>
    %10 = tpu.matmul %8, %9, %cst {dimension_numbers = #tpu.dot_dimension_numbers<[1], [0], [0], [1], [0, 0, 1, 1], [], []>} : vector<16x256xbf16>, vector<256x256xbf16>, vector<16x256xf32> -> vector<16x256xf32>
    %c0_i32_4 = arith.constant 0 : i32
    %11 = arith.cmpi eq, %arg2, %c0_i32_4 : i32
    %12 = arith.extui %11 : i1 to i32
    %c0_i32_5 = arith.constant 0 : i32
    %13 = arith.cmpi ne, %12, %c0_i32_5 : i32
    scf.if %13 {
      %c0_10 = arith.constant 0 : index
      %c0_11 = arith.constant 0 : index
      %20 = vector.load %arg8[%c0_10, %c0_11] : memref<16x256xf32, #tpu.memory_space<vmem>>, vector<16x256xf32>
      tpu.vector_store %arg8[%c0_10, %c0_11], %10 {strides = array<i32>} : memref<16x256xf32, #tpu.memory_space<vmem>>, vector<16x256xf32>,
    } else {
    }
    %c0_i32_6 = arith.constant 0 : i32
    %14 = arith.cmpi ne, %arg2, %c0_i32_6 : i32
    %15 = arith.extui %14 : i1 to i32
    %c0_i32_7 = arith.constant 0 : i32
    %16 = arith.cmpi ne, %15, %c0_i32_7 : i32
    scf.if %16 {
      %c0_10 = arith.constant 0 : index
      %c0_11 = arith.constant 0 : index
      %20 = vector.load %arg8[%c0_10, %c0_11] : memref<16x256xf32, #tpu.memory_space<vmem>>, vector<16x256xf32>
      %21 = arith.addf %20, %10 : vector<16x256xf32>
      %c0_12 = arith.constant 0 : index
      %c0_13 = arith.constant 0 : index
      %22 = vector.load %arg8[%c0_12, %c0_13] : memref<16x256xf32, #tpu.memory_space<vmem>>, vector<16x256xf32>
      tpu.vector_store %arg8[%c0_12, %c0_13], %21 {strides = array<i32>} : memref<16x256xf32, #tpu.memory_space<vmem>>, vector<16x256xf32>,
    } else {
    }
    %c0_i32_8 = arith.constant 0 : i32
    %17 = arith.cmpi eq, %arg2, %c0_i32_8 : i32
    %18 = arith.extui %17 : i1 to i32
    %c0_i32_9 = arith.constant 0 : i32
    %19 = arith.cmpi ne, %18, %c0_i32_9 : i32
    scf.if %19 {
      %c0_10 = arith.constant 0 : index
      %c0_11 = arith.constant 0 : index
      %20 = vector.load %arg8[%c0_10, %c0_11] : memref<16x256xf32, #tpu.memory_space<vmem>>, vector<16x256xf32>
      %cst_12 = arith.constant dense<0xFF800000> : vector<16xf32>
      %21 = vector.multi_reduction <maximumf>, %20, %cst_12 [1] : vector<16x256xf32> to vector<16xf32>
      %22 = vector.shape_cast %21 : vector<16xf32> to vector<16x1xf32>
      %c0_13 = arith.constant 0 : index
      %c0_14 = arith.constant 0 : index
      %23 = vector.load %arg9[%c0_13, %c0_14] : memref<16x1xf32, #tpu.memory_space<vmem>>, vector<16x1xf32>
      %24 = arith.maximumf %23, %22 : vector<16x1xf32>
      %c0_15 = arith.constant 0 : index
      %c0_16 = arith.constant 0 : index
      %25 = vector.load %arg10[%c0_15, %c0_16] : memref<16x1xf32, #tpu.memory_space<vmem>>, vector<16x1xf32>
      %c0_17 = arith.constant 0 : index
      %c0_18 = arith.constant 0 : index
      %26 = vector.load %arg9[%c0_17, %c0_18] : memref<16x1xf32, #tpu.memory_space<vmem>>, vector<16x1xf32>
      %27 = arith.subf %26, %24 : vector<16x1xf32>
      %28 = math.exp %27 : vector<16x1xf32>
      %29 = arith.mulf %25, %28 : vector<16x1xf32>
      %30 = vector.broadcast %24 : vector<16x1xf32> to vector<16x256xf32>
      %31 = arith.subf %20, %30 : vector<16x256xf32>
      %32 = math.exp %31 : vector<16x256xf32>
      %cst_19 = arith.constant dense<0.000000e+00> : vector<16xf32>
      %33 = vector.multi_reduction <add>, %32, %cst_19 [1] : vector<16x256xf32> to vector<16xf32>
      %34 = vector.shape_cast %33 : vector<16xf32> to vector<16x1xf32>
      %35 = arith.addf %29, %34 : vector<16x1xf32>
      %c0_20 = arith.constant 0 : index
      %c0_21 = arith.constant 0 : index
      %36 = vector.load %arg10[%c0_20, %c0_21] : memref<16x1xf32, #tpu.memory_space<vmem>>, vector<16x1xf32>
      tpu.vector_store %arg10[%c0_20, %c0_21], %35 {strides = array<i32>} : memref<16x1xf32, #tpu.memory_space<vmem>>, vector<16x1xf32>,
      %c0_22 = arith.constant 0 : index
      %c0_23 = arith.constant 0 : index
      %37 = vector.load %arg9[%c0_22, %c0_23] : memref<16x1xf32, #tpu.memory_space<vmem>>, vector<16x1xf32>
      tpu.vector_store %arg9[%c0_22, %c0_23], %24 {strides = array<i32>} : memref<16x1xf32, #tpu.memory_space<vmem>>, vector<16x1xf32>,
      %c256_i32_24 = arith.constant 256 : i32
      %38 = arith.muli %arg1, %c256_i32_24 : i32
      %39 = tpu.iota {dimensions = array<i32: 1>} : vector<1x256xi32>
      %c0_25 = arith.constant 0 : index
      %c0_26 = arith.constant 0 : index
      %c0_27 = arith.constant 0 : index
      %40 = vector.load %arg5[%c0_25, %c0_26, %c0_27] : memref<2x3x8xi32, #tpu.memory_space<vmem>>, vector<2x3x8xi32>
      %41 = vector.broadcast %38 : i32 to vector<2x3x8xi32>
      %42 = arith.subi %40, %41 : vector<2x3x8xi32>
      %43 = vector.extract_strided_slice %20 {offsets = [0, 0], sizes = [8, 256], strides = [1, 1]} : vector<16x256xf32> to vector<8x256xf32>
      %44 = vector.extract_strided_slice %42 {offsets = [0, 0, 0], sizes = [1, 3, 8], strides = [1, 1, 1]} : vector<2x3x8xi32> to vector<1x3x8xi32>
      %45 = vector.shape_cast %44 : vector<1x3x8xi32> to vector<3x8xi32>
      %46 = tpu.transpose %45, [1, 0] : vector<3x8xi32> -> vector<8x3xi32>
      %47 = vector.extract_strided_slice %46 {offsets = [0, 0], sizes = [8, 1], strides = [1, 1]} : vector<8x3xi32> to vector<8x1xi32>
      %48 = vector.broadcast %47 : vector<8x1xi32> to vector<8x256xi32>
      %49 = vector.broadcast %39 : vector<1x256xi32> to vector<8x256xi32>
      %50 = arith.cmpi eq, %48, %49 : vector<8x256xi32>
      %c0_28 = arith.constant 0 : index
      %c0_29 = arith.constant 0 : index
      %c0_30 = arith.constant 0 : index
      %51 = vector.load %arg11[%c0_28, %c0_29, %c0_30] : memref<2x3x8xf32, #tpu.memory_space<vmem>>, vector<1x1x8xf32>
      %52 = vector.shape_cast %51 : vector<1x1x8xf32> to vector<8xf32>
      %cst_31 = arith.constant 0.000000e+00 : f32
      %53 = vector.broadcast %cst_31 : f32 to vector<8x256xf32>
      %54 = arith.select %50, %43, %53 : vector<8x256xi1>, vector<8x256xf32>
      %cst_32 = arith.constant dense<0.000000e+00> : vector<8xf32>
      %55 = vector.multi_reduction <add>, %54, %cst_32 [1] : vector<8x256xf32> to vector<8xf32>
      %56 = arith.addf %52, %55 : vector<8xf32>
      %c0_33 = arith.constant 0 : index
      %c0_34 = arith.constant 0 : index
      %c0_35 = arith.constant 0 : index
      %57 = vector.load %arg11[%c0_33, %c0_34, %c0_35] : memref<2x3x8xf32, #tpu.memory_space<vmem>>, vector<1x1x8xf32>
      %58 = vector.shape_cast %57 : vector<1x1x8xf32> to vector<8xf32>
      %59 = vector.shape_cast %56 : vector<8xf32> to vector<1x1x8xf32>
      tpu.vector_store %arg11[%c0_33, %c0_34, %c0_35], %59 {strides = array<i32>} : memref<2x3x8xf32, #tpu.memory_space<vmem>>, vector<1x1x8xf32>,
      %60 = vector.extract_strided_slice %46 {offsets = [0, 1], sizes = [8, 1], strides = [1, 1]} : vector<8x3xi32> to vector<8x1xi32>
      %61 = vector.broadcast %60 : vector<8x1xi32> to vector<8x256xi32>
      %62 = vector.broadcast %39 : vector<1x256xi32> to vector<8x256xi32>
      %63 = arith.cmpi eq, %61, %62 : vector<8x256xi32>
      %c0_36 = arith.constant 0 : index
      %c1 = arith.constant 1 : index
      %c0_37 = arith.constant 0 : index
      %64 = vector.load %arg11[%c0_36, %c1, %c0_37] : memref<2x3x8xf32, #tpu.memory_space<vmem>>, vector<1x1x8xf32>
      %65 = vector.shape_cast %64 : vector<1x1x8xf32> to vector<8xf32>
      %cst_38 = arith.constant 0.000000e+00 : f32
      %66 = vector.broadcast %cst_38 : f32 to vector<8x256xf32>
      %67 = arith.select %63, %43, %66 : vector<8x256xi1>, vector<8x256xf32>
      %cst_39 = arith.constant dense<0.000000e+00> : vector<8xf32>
      %68 = vector.multi_reduction <add>, %67, %cst_39 [1] : vector<8x256xf32> to vector<8xf32>
      %69 = arith.addf %65, %68 : vector<8xf32>
      %c0_40 = arith.constant 0 : index
      %c1_41 = arith.constant 1 : index
      %c0_42 = arith.constant 0 : index
      %70 = vector.load %arg11[%c0_40, %c1_41, %c0_42] : memref<2x3x8xf32, #tpu.memory_space<vmem>>, vector<1x1x8xf32>
      %71 = vector.shape_cast %70 : vector<1x1x8xf32> to vector<8xf32>
      %72 = vector.shape_cast %69 : vector<8xf32> to vector<1x1x8xf32>
      tpu.vector_store %arg11[%c0_40, %c1_41, %c0_42], %72 {strides = array<i32>} : memref<2x3x8xf32, #tpu.memory_space<vmem>>, vector<1x1x8xf32>,
      %73 = vector.extract_strided_slice %46 {offsets = [0, 2], sizes = [8, 1], strides = [1, 1]} : vector<8x3xi32> to vector<8x1xi32>
      %74 = vector.broadcast %73 : vector<8x1xi32> to vector<8x256xi32>
      %75 = vector.broadcast %39 : vector<1x256xi32> to vector<8x256xi32>
      %76 = arith.cmpi eq, %74, %75 : vector<8x256xi32>
      %c0_43 = arith.constant 0 : index
      %c2 = arith.constant 2 : index
      %c0_44 = arith.constant 0 : index
      %77 = vector.load %arg11[%c0_43, %c2, %c0_44] : memref<2x3x8xf32, #tpu.memory_space<vmem>>, vector<1x1x8xf32>
      %78 = vector.shape_cast %77 : vector<1x1x8xf32> to vector<8xf32>
      %cst_45 = arith.constant 0.000000e+00 : f32
      %79 = vector.broadcast %cst_45 : f32 to vector<8x256xf32>
      %80 = arith.select %76, %43, %79 : vector<8x256xi1>, vector<8x256xf32>
      %cst_46 = arith.constant dense<0.000000e+00> : vector<8xf32>
      %81 = vector.multi_reduction <add>, %80, %cst_46 [1] : vector<8x256xf32> to vector<8xf32>
      %82 = arith.addf %78, %81 : vector<8xf32>
      %c0_47 = arith.constant 0 : index
      %c2_48 = arith.constant 2 : index
      %c0_49 = arith.constant 0 : index
      %83 = vector.load %arg11[%c0_47, %c2_48, %c0_49] : memref<2x3x8xf32, #tpu.memory_space<vmem>>, vector<1x1x8xf32>
      %84 = vector.shape_cast %83 : vector<1x1x8xf32> to vector<8xf32>
      %85 = vector.shape_cast %82 : vector<8xf32> to vector<1x1x8xf32>
      tpu.vector_store %arg11[%c0_47, %c2_48, %c0_49], %85 {strides = array<i32>} : memref<2x3x8xf32, #tpu.memory_space<vmem>>, vector<1x1x8xf32>,
      %86 = vector.extract_strided_slice %20 {offsets = [8, 0], sizes = [8, 256], strides = [1, 1]} : vector<16x256xf32> to vector<8x256xf32>
      %87 = vector.extract_strided_slice %42 {offsets = [1, 0, 0], sizes = [1, 3, 8], strides = [1, 1, 1]} : vector<2x3x8xi32> to vector<1x3x8xi32>
      %88 = vector.shape_cast %87 : vector<1x3x8xi32> to vector<3x8xi32>
      %89 = tpu.transpose %88, [1, 0] : vector<3x8xi32> -> vector<8x3xi32>
      %90 = vector.extract_strided_slice %89 {offsets = [0, 0], sizes = [8, 1], strides = [1, 1]} : vector<8x3xi32> to vector<8x1xi32>
      %91 = vector.broadcast %90 : vector<8x1xi32> to vector<8x256xi32>
      %92 = vector.broadcast %39 : vector<1x256xi32> to vector<8x256xi32>
      %93 = arith.cmpi eq, %91, %92 : vector<8x256xi32>
      %c1_50 = arith.constant 1 : index
      %c0_51 = arith.constant 0 : index
      %c0_52 = arith.constant 0 : index
      %94 = vector.load %arg11[%c1_50, %c0_51, %c0_52] : memref<2x3x8xf32, #tpu.memory_space<vmem>>, vector<1x1x8xf32>
      %95 = vector.shape_cast %94 : vector<1x1x8xf32> to vector<8xf32>
      %cst_53 = arith.constant 0.000000e+00 : f32
      %96 = vector.broadcast %cst_53 : f32 to vector<8x256xf32>
      %97 = arith.select %93, %86, %96 : vector<8x256xi1>, vector<8x256xf32>
      %cst_54 = arith.constant dense<0.000000e+00> : vector<8xf32>
      %98 = vector.multi_reduction <add>, %97, %cst_54 [1] : vector<8x256xf32> to vector<8xf32>
      %99 = arith.addf %95, %98 : vector<8xf32>
      %c1_55 = arith.constant 1 : index
      %c0_56 = arith.constant 0 : index
      %c0_57 = arith.constant 0 : index
      %100 = vector.load %arg11[%c1_55, %c0_56, %c0_57] : memref<2x3x8xf32, #tpu.memory_space<vmem>>, vector<1x1x8xf32>
      %101 = vector.shape_cast %100 : vector<1x1x8xf32> to vector<8xf32>
      %102 = vector.shape_cast %99 : vector<8xf32> to vector<1x1x8xf32>
      tpu.vector_store %arg11[%c1_55, %c0_56, %c0_57], %102 {strides = array<i32>} : memref<2x3x8xf32, #tpu.memory_space<vmem>>, vector<1x1x8xf32>,
      %103 = vector.extract_strided_slice %89 {offsets = [0, 1], sizes = [8, 1], strides = [1, 1]} : vector<8x3xi32> to vector<8x1xi32>
      %104 = vector.broadcast %103 : vector<8x1xi32> to vector<8x256xi32>
      %105 = vector.broadcast %39 : vector<1x256xi32> to vector<8x256xi32>
      %106 = arith.cmpi eq, %104, %105 : vector<8x256xi32>
      %c1_58 = arith.constant 1 : index
      %c1_59 = arith.constant 1 : index
      %c0_60 = arith.constant 0 : index
      %107 = vector.load %arg11[%c1_58, %c1_59, %c0_60] : memref<2x3x8xf32, #tpu.memory_space<vmem>>, vector<1x1x8xf32>
      %108 = vector.shape_cast %107 : vector<1x1x8xf32> to vector<8xf32>
      %cst_61 = arith.constant 0.000000e+00 : f32
      %109 = vector.broadcast %cst_61 : f32 to vector<8x256xf32>
      %110 = arith.select %106, %86, %109 : vector<8x256xi1>, vector<8x256xf32>
      %cst_62 = arith.constant dense<0.000000e+00> : vector<8xf32>
      %111 = vector.multi_reduction <add>, %110, %cst_62 [1] : vector<8x256xf32> to vector<8xf32>
      %112 = arith.addf %108, %111 : vector<8xf32>
      %c1_63 = arith.constant 1 : index
      %c1_64 = arith.constant 1 : index
      %c0_65 = arith.constant 0 : index
      %113 = vector.load %arg11[%c1_63, %c1_64, %c0_65] : memref<2x3x8xf32, #tpu.memory_space<vmem>>, vector<1x1x8xf32>
      %114 = vector.shape_cast %113 : vector<1x1x8xf32> to vector<8xf32>
      %115 = vector.shape_cast %112 : vector<8xf32> to vector<1x1x8xf32>
      tpu.vector_store %arg11[%c1_63, %c1_64, %c0_65], %115 {strides = array<i32>} : memref<2x3x8xf32, #tpu.memory_space<vmem>>, vector<1x1x8xf32>,
      %116 = vector.extract_strided_slice %89 {offsets = [0, 2], sizes = [8, 1], strides = [1, 1]} : vector<8x3xi32> to vector<8x1xi32>
      %117 = vector.broadcast %116 : vector<8x1xi32> to vector<8x256xi32>
      %118 = vector.broadcast %39 : vector<1x256xi32> to vector<8x256xi32>
      %119 = arith.cmpi eq, %117, %118 : vector<8x256xi32>
      %c1_66 = arith.constant 1 : index
      %c2_67 = arith.constant 2 : index
      %c0_68 = arith.constant 0 : index
      %120 = vector.load %arg11[%c1_66, %c2_67, %c0_68] : memref<2x3x8xf32, #tpu.memory_space<vmem>>, vector<1x1x8xf32>
      %121 = vector.shape_cast %120 : vector<1x1x8xf32> to vector<8xf32>
      %cst_69 = arith.constant 0.000000e+00 : f32
      %122 = vector.broadcast %cst_69 : f32 to vector<8x256xf32>
      %123 = arith.select %119, %86, %122 : vector<8x256xi1>, vector<8x256xf32>
      %cst_70 = arith.constant dense<0.000000e+00> : vector<8xf32>
      %124 = vector.multi_reduction <add>, %123, %cst_70 [1] : vector<8x256xf32> to vector<8xf32>
      %125 = arith.addf %121, %124 : vector<8xf32>
      %c1_71 = arith.constant 1 : index
      %c2_72 = arith.constant 2 : index
      %c0_73 = arith.constant 0 : index
      %126 = vector.load %arg11[%c1_71, %c2_72, %c0_73] : memref<2x3x8xf32, #tpu.memory_space<vmem>>, vector<1x1x8xf32>
      %127 = vector.shape_cast %126 : vector<1x1x8xf32> to vector<8xf32>
      %128 = vector.shape_cast %125 : vector<8xf32> to vector<1x1x8xf32>
      tpu.vector_store %arg11[%c1_71, %c2_72, %c0_73], %128 {strides = array<i32>} : memref<2x3x8xf32, #tpu.memory_space<vmem>>, vector<1x1x8xf32>,
      %c0_i32_74 = arith.constant 0 : i32
      %129 = arith.cmpi eq, %arg1, %c0_i32_74 : i32
      %130 = arith.extui %129 : i1 to i32
      %c0_i32_75 = arith.constant 0 : i32
      %131 = arith.cmpi ne, %130, %c0_i32_75 : i32
      scf.if %131 {
        %c0_76 = arith.constant 0 : index
        %c0_77 = arith.constant 0 : index
        %132 = vector.load %arg9[%c0_76, %c0_77] : memref<16x1xf32, #tpu.memory_space<vmem>>, vector<16x1xf32>
        %c0_78 = arith.constant 0 : index
        %c0_79 = arith.constant 0 : index
        %133 = vector.load %arg10[%c0_78, %c0_79] : memref<16x1xf32, #tpu.memory_space<vmem>>, vector<16x1xf32>
        %134 = math.log %133 : vector<16x1xf32>
        %135 = arith.addf %132, %134 : vector<16x1xf32>
        %136 = vector.extract_strided_slice %135 {offsets = [0, 0], sizes = [8, 1], strides = [1, 1]} : vector<16x1xf32> to vector<8x1xf32>
        %137 = tpu.transpose %136, [1, 0] : vector<8x1xf32> -> vector<1x8xf32>
        %c0_80 = arith.constant 0 : index
        %c0_81 = arith.constant 0 : index
        %c0_82 = arith.constant 0 : index
        %138 = vector.load %arg6[%c0_80, %c0_81, %c0_82] : memref<2x3x8xf32, #tpu.memory_space<vmem>>, vector<1x3x8xf32>
        %139 = vector.shape_cast %138 : vector<1x3x8xf32> to vector<3x8xf32>
        %c0_83 = arith.constant 0 : index
        %c0_84 = arith.constant 0 : index
        %c0_85 = arith.constant 0 : index
        %140 = vector.load %arg11[%c0_83, %c0_84, %c0_85] : memref<2x3x8xf32, #tpu.memory_space<vmem>>, vector<1x3x8xf32>
        %141 = vector.shape_cast %140 : vector<1x3x8xf32> to vector<3x8xf32>
        %142 = vector.broadcast %137 : vector<1x8xf32> to vector<3x8xf32>
        %143 = arith.subf %141, %142 : vector<3x8xf32>
        %144 = arith.mulf %139, %143 : vector<3x8xf32>
        %cst_86 = arith.constant dense<0.000000e+00> : vector<3xf32>
        %145 = vector.multi_reduction <add>, %144, %cst_86 [1] : vector<3x8xf32> to vector<3xf32>
        %c0_87 = arith.constant 0 : index
        %c0_88 = arith.constant 0 : index
        %146 = vector.load %arg7[%c0_87, %c0_88] : memref<2x3xf32, #tpu.memory_space<vmem>>, vector<1x3xf32>
        %147 = vector.shape_cast %146 : vector<1x3xf32> to vector<3xf32>
        %148 = vector.shape_cast %145 : vector<3xf32> to vector<1x3xf32>
        tpu.vector_store %arg7[%c0_87, %c0_88], %148 {strides = array<i32>} : memref<2x3xf32, #tpu.memory_space<vmem>>, vector<1x3xf32>,
        %149 = vector.extract_strided_slice %135 {offsets = [8, 0], sizes = [8, 1], strides = [1, 1]} : vector<16x1xf32> to vector<8x1xf32>
        %150 = tpu.transpose %149, [1, 0] : vector<8x1xf32> -> vector<1x8xf32>
        %c1_89 = arith.constant 1 : index
        %c0_90 = arith.constant 0 : index
        %c0_91 = arith.constant 0 : index
        %151 = vector.load %arg6[%c1_89, %c0_90, %c0_91] : memref<2x3x8xf32, #tpu.memory_space<vmem>>, vector<1x3x8xf32>
        %152 = vector.shape_cast %151 : vector<1x3x8xf32> to vector<3x8xf32>
        %c1_92 = arith.constant 1 : index
        %c0_93 = arith.constant 0 : index
        %c0_94 = arith.constant 0 : index
        %153 = vector.load %arg11[%c1_92, %c0_93, %c0_94] : memref<2x3x8xf32, #tpu.memory_space<vmem>>, vector<1x3x8xf32>
        %154 = vector.shape_cast %153 : vector<1x3x8xf32> to vector<3x8xf32>
        %155 = vector.broadcast %150 : vector<1x8xf32> to vector<3x8xf32>
        %156 = arith.subf %154, %155 : vector<3x8xf32>
        %157 = arith.mulf %152, %156 : vector<3x8xf32>
        %cst_95 = arith.constant dense<0.000000e+00> : vector<3xf32>
        %158 = vector.multi_reduction <add>, %157, %cst_95 [1] : vector<3x8xf32> to vector<3xf32>
        %c1_96 = arith.constant 1 : index
        %c0_97 = arith.constant 0 : index
        %159 = vector.load %arg7[%c1_96, %c0_97] : memref<2x3xf32, #tpu.memory_space<vmem>>, vector<1x3xf32>
        %160 = vector.shape_cast %159 : vector<1x3xf32> to vector<3xf32>
        %161 = vector.shape_cast %158 : vector<3xf32> to vector<1x3xf32>
        tpu.vector_store %arg7[%c1_96, %c0_97], %161 {strides = array<i32>} : memref<2x3xf32, #tpu.memory_space<vmem>>, vector<1x3xf32>,
      } else {
      }
    } else {
    }
    return
  }
  func.func @transform_0(%arg0: i32, %arg1: i32, %arg2: i32) -> (i32, i32) {
    %c0_i32 = arith.constant 0 : i32
    %c0_i32_0 = arith.constant 0 : i32
    return %arg0, %c0_i32 : i32, i32
  }
  func.func @transform_1(%arg0: i32, %arg1: i32, %arg2: i32) -> (i32, i32) {
    %c0_i32 = arith.constant 0 : i32
    return %arg2, %arg1 : i32, i32
  }
  func.func @transform_2(%arg0: i32, %arg1: i32, %arg2: i32) -> (i32, i32, i32) {
    %c0_i32 = arith.constant 0 : i32
    %c0_i32_0 = arith.constant 0 : i32
    %c0_i32_1 = arith.constant 0 : i32
    return %arg0, %c0_i32, %c0_i32_0 : i32, i32, i32
  }
  func.func @transform_3(%arg0: i32, %arg1: i32, %arg2: i32) -> (i32, i32, i32) {
    %c0_i32 = arith.constant 0 : i32
    %c0_i32_0 = arith.constant 0 : i32
    %c0_i32_1 = arith.constant 0 : i32
    return %arg0, %c0_i32, %c0_i32_0 : i32, i32, i32
  }
  func.func @transform_4(%arg0: i32, %arg1: i32, %arg2: i32) -> (i32, i32) {
    %c0_i32 = arith.constant 0 : i32
    %c0_i32_0 = arith.constant 0 : i32
    return %arg0, %c0_i32 : i32, i32
  }
}

</mosaic_0001>

<bundles_post_ra>
// kernel: tpu_custom_call.1
= control target key start
LH: loop header
LB: loop body
LE: loop exit
PB: predicated region body
PF: predicated region fallthrough
CT: control target
= control target key end

     0   :  { %9 = vsyncpa [#allocation7], 0  ;;  %s1048_s0 = inlined_call_operand.vmem [shape: bf16[16,256], index: 0, kind: input, shape index: {}]   ;;  %s1049_s1 = inlined_call_operand.hbm [shape: bf16[256,256], index: 1, kind: input, shape index: {}]   ;;  %s1050_s2 = inlined_call_operand.vmem [shape: s32[2,3,8], index: 2, kind: input, shape index: {}]   ;;  %s1051_s3 = inlined_call_operand.vmem [shape: f32[2,3,8], index: 3, kind: input, shape index: {}]   ;;  %s1052_s4 = inlined_call_operand.hbm [shape: f32[2,3], index: 4, kind: output, shape index: {}]  }
   0x1   :  { %10 = vsyncpa [#allocation8], 0  ;;  %s868_s15 = smov [#allocation6]   ;;  %s820_s19 = scalar_lea.hbm %s1049_s1, 4096 }
   0x2   :  { %s18_s16 = sshll.u32 %s868_s15, 4  ;;  %p821_p0 = scmp.ne.s32.totalorder %s1049_s1, %s820_s19  ;;  %s19_s16 = int_to_ptr.vmem [resolvable:$true] %s18_s16 }
   0x3   :  { %p824_p1 = scmp.lt.u32.totalorder %s820_s19, %s1049_s1 }
   0x5   :  { %p826_p2 = pnand %p824_p1, %p821_p0 }
   0x7   :  { %829 = shalt.err (!%p826_p2)
}
   0x8   :  { %s830_s24 = scalar_lea.vmem %s19_s16, 4096  ;;  %p835_p4 = scmp.lt.s32.totalorder %s19_s16, %s19_s16 }
   0x9   :  { %p831_p3 = scmp.ne.s32.totalorder %s19_s16, %s830_s24  ;;  %p836_p5 = scmp.lt.s32.totalorder %s830_s24, %s830_s24 }
   0xb   :  { %p837_p6 = por %p836_p5, %p835_p4 }
   0xd   :  { %p838_p7 = pnand %p837_p6, %p831_p3 }
   0xf   :  { %841 = shalt.err (!%p838_p7)
}
  0x10   :  { %s869_s25 = smov 128   ;;  %s870_s26 = smov 8  }
  0x11   :  { %24 = dma.hbm_to_vmem [thread:$0]  %s1049_s1, 4096, %s19_s16, [#allocation7], %s869_s25, %s869_s25, %s870_s26  }
  0x12   :  { %864 = dma.done.wait [#allocation7], 4096  }
  0x13   :  { %865 = vsyncadd [#allocation7], 4294963200  ;;  %v753_v0 = vld [vmem:[#allocation6 + $0x4] ss:$8 sps:$4 sm:$0xff]   ;;  %v755_v1 = vld [vmem:[#allocation6] ss:$8 sps:$4 sm:$0xff]   ;;  %v384_v55 = vlaneseq }
  0x14   :  { %255 = vmatprep.subr.bf16.mxu0 %v753_v0  ;;  %v756_v2 = vld [vmem:[#allocation6 + $0x14] ss:$8 sps:$4 sm:$0xff]   ;;  %v758_v3 = vld [vmem:[#allocation6 + $0x10] ss:$8 sps:$4 sm:$0xff]   ;;  %v759_v4 = vld [vmem:[#allocation6 + $0x24] ss:$8 sps:$4 sm:$0xff]  }
  0x15   :  { %256 = vmatpush1.bf16.msra.mxu0 %v755_v1  ;;  %v761_v5 = vld [vmem:[#allocation6 + $0x20] ss:$8 sps:$4 sm:$0xff]   ;;  %v762_v6 = vld [vmem:[#allocation6 + $0x34] ss:$8 sps:$4 sm:$0xff]   ;;  %v764_v7 = vld [vmem:[#allocation6 + $0x30] ss:$8 sps:$4 sm:$0xff]  }
  0x16   :  { %257 = vmatprep.subr.bf16.mxu0 %v756_v2  ;;  %v765_v8 = vld [vmem:[#allocation6 + $0x44] ss:$8 sps:$4 sm:$0xff]   ;;  %v767_v9 = vld [vmem:[#allocation6 + $0x40] ss:$8 sps:$4 sm:$0xff]   ;;  %v768_v10 = vld [vmem:[#allocation6 + $0x54] ss:$8 sps:$4 sm:$0xff]  }
  0x17   :  { %v770_v11 = vld [vmem:[#allocation6 + $0x50] ss:$8 sps:$4 sm:$0xff]   ;;  %v771_v12 = vld [vmem:[#allocation6 + $0x64] ss:$8 sps:$4 sm:$0xff]   ;;  %v773_v14 = vld [vmem:[#allocation6 + $0x60] ss:$8 sps:$4 sm:$0xff]  }
  0x18   :  { %v803_v13 = vld [vmem:[%s1048_s0 + $0x4] ss:$8 sps:$4 sm:$0xff]   ;;  %v776_v16 = vld [vmem:[#allocation6 + $0x70] ss:$8 sps:$4 sm:$0xff]   ;;  %v779_v18 = vld [vmem:[#allocation6 + $0x80] ss:$8 sps:$4 sm:$0xff]  }
  0x19   :  { %258 = vmatpush1.bf16.msra.mxu0 %v758_v3  ;;  %v774_v15 = vld [vmem:[#allocation6 + $0x74] ss:$8 sps:$4 sm:$0xff]   ;;  %287 = vmatprep.mubr.bf16.mxu0 %v803_v13  ;;  %v777_v17 = vld [vmem:[#allocation6 + $0x84] ss:$8 sps:$4 sm:$0xff]   ;;  %v782_v20 = vld [vmem:[#allocation6 + $0x90] ss:$8 sps:$4 sm:$0xff]  }
  0x1a   :  { %259 = vmatprep.subr.bf16.mxu0 %v759_v4  ;;  %v780_v19 = vld [vmem:[#allocation6 + $0x94] ss:$8 sps:$4 sm:$0xff]   ;;  %v783_v21 = vld [vmem:[#allocation6 + $0xa4] ss:$8 sps:$4 sm:$0xff]   ;;  %v785_v22 = vld [vmem:[#allocation6 + $0xa0] ss:$8 sps:$4 sm:$0xff]  }
  0x1b   :  { %v786_v23 = vld [vmem:[#allocation6 + $0xb4] ss:$8 sps:$4 sm:$0xff]   ;;  %v788_v24 = vld [vmem:[#allocation6 + $0xb0] ss:$8 sps:$4 sm:$0xff]   ;;  %v789_v25 = vld [vmem:[#allocation6 + $0xc4] ss:$8 sps:$4 sm:$0xff]  }
  0x1c   :  { %v791_v26 = vld [vmem:[#allocation6 + $0xc0] ss:$8 sps:$4 sm:$0xff]   ;;  %v792_v27 = vld [vmem:[#allocation6 + $0xd4] ss:$8 sps:$4 sm:$0xff]   ;;  %v794_v28 = vld [vmem:[#allocation6 + $0xd0] ss:$8 sps:$4 sm:$0xff]  }
  0x1d   :  { %260 = vmatpush1.bf16.msra.mxu0 %v761_v5  ;;  %v795_v29 = vld [vmem:[#allocation6 + $0xe4] ss:$8 sps:$4 sm:$0xff]   ;;  %v797_v30 = vld [vmem:[#allocation6 + $0xe0] ss:$8 sps:$4 sm:$0xff]   ;;  %v798_v31 = vld [vmem:[#allocation6 + $0xf4] ss:$8 sps:$4 sm:$0xff]  }
  0x1e   :  { %261 = vmatprep.subr.bf16.mxu0 %v762_v6  ;;  %v800_v32 = vld [vmem:[#allocation6 + $0xf0] ss:$8 sps:$4 sm:$0xff]   ;;  %vm38_vm0 = vcmask 7168   ;;  %v871_v34 = vmov -inf   ;;  %v872_v41 = vmov 0.0   ;;  %v873_v42 = vmov 0  }
  0x1f   :  { %v801_v33 = vld [vmem:[%s1048_s0] ss:$8 sps:$4 sm:$0xff]   ;;  %39 = vst.msk [vmem:[#allocation3] sm:$0xff] %vm38_vm0, %v871_v34  ;;  %40 = vst.msk [vmem:[#allocation3 + $0x8] sm:$0xff] %vm38_vm0, %v871_v34  ;;  %749 = vset.pattern.permute.xlu1 %v873_v42  ;;  %v388_v53 = vld [vmem:[%s1050_s2 + $0x4] sm:$0x7] }
  0x20   :  { %41 = vst.msk [vmem:[#allocation4] sm:$0xff] %vm38_vm0, %v872_v41  ;;  %42 = vst.msk [vmem:[#allocation4 + $0x8] sm:$0xff] %vm38_vm0, %v872_v41  ;;  %v387_v43 = vld [vmem:[%s1050_s2] sm:$0x7]  ;;  %v874_v54 = vmov 1   ;;  %vm43_vm1 = vcmask 59392  }
  0x21   :  { %262 = vmatpush1.bf16.msra.mxu0 %v764_v7  ;;  %44 = vst.msk [vmem:[#allocation5] sm:$0x7] %vm43_vm1, %v872_v41  ;;  %45 = vst.msk [vmem:[#allocation5 + $0x4] sm:$0x7] %vm43_vm1, %v872_v41  ;;  %v964_v56 = vand.u32 127, %v384_v55  ;;  %vm442_vm6 = vcmask 57344  }
  0x22   :  { %263 = vmatprep.subr.bf16.mxu0 %v765_v8  ;;  %vm635_vm15 = vcmask 16384   ;;  %s876_s12 = smov [#allocation9]  }
  0x23   :  { %v967_v57 = vadd.s32 128, %v964_v56  ;;  %s694_s13 = sshll.u32 %s876_s12, 4  ;;  %s695_s13 = int_to_ptr.vmem [resolvable:$true] %s694_s13 }
  0x24   :  { %s842_s14 = scalar_lea.vmem %s695_s13, 32  ;;  %p847_p9 = scmp.lt.s32.totalorder %s695_s13, %s695_s13 }
  0x25   :  { %264 = vmatpush1.bf16.msra.mxu0 %v767_v9  ;;  %p843_p8 = scmp.ne.s32.totalorder %s695_s13, %s842_s14  ;;  %p848_p10 = scmp.lt.s32.totalorder %s842_s14, %s842_s14 }
  0x26   :  { %265 = vmatprep.subr.bf16.mxu0 %v768_v10  ;;  %v939_v44 = vld [vmem:[#allocation3] sm:$0xff]  ;;  %v944_v47 = vld [vmem:[#allocation3 + $0x8] sm:$0xff] }
  0x27   :  { %v338_v41 = vld [vmem:[#allocation4] sm:$0xff]  ;;  %p849_p11 = por %p848_p10, %p847_p9 }
  0x29   :  { %266 = vmatpush1.bf16.msra.mxu0 %v770_v11  ;;  %p850_p12 = pnand %p849_p11, %p843_p8 }
  0x2a   :  { %267 = vmatprep.subr.bf16.mxu0 %v771_v12 }
  0x2d   :  { %268 = vmatpush1.bf16.msra.mxu0 %v773_v14 }
  0x2e   :  { %269 = vmatprep.subr.bf16.mxu0 %v774_v15  ;;  %v875_v15 = vmov 2  }
  0x31   :  { %270 = vmatpush1.bf16.msra.mxu0 %v776_v16 }
  0x32   :  { %271 = vmatprep.subr.bf16.mxu0 %v777_v17 }
  0x35   :  { %272 = vmatpush1.bf16.msra.mxu0 %v779_v18 }
  0x36   :  { %273 = vmatprep.subr.bf16.mxu0 %v780_v19 }
  0x39   :  { %274 = vmatpush1.bf16.msra.mxu0 %v782_v20  ;;  %v981_v20 = vshrl.u32 %v384_v55, 7 }
  0x3a   :  { %275 = vmatprep.subr.bf16.mxu0 %v783_v21 }
  0x3b   :  { %v985_v21 = vsub.s32 %v964_v56, %v981_v20 }
  0x3d   :  { %276 = vmatpush1.bf16.msra.mxu0 %v785_v22 }
  0x3e   :  { %277 = vmatprep.subr.bf16.mxu0 %v786_v23  ;;  %v429_v23 = vld [vmem:[#allocation5] sm:$0x1] }
  0x41   :  { %278 = vmatpush1.bf16.msra.mxu0 %v788_v24 }
  0x42   :  { %279 = vmatprep.subr.bf16.mxu0 %v789_v25 }
  0x45   :  { %280 = vmatpush1.bf16.msra.mxu0 %v791_v26 }
  0x46   :  { %281 = vmatprep.subr.bf16.mxu0 %v792_v27 }
  0x49   :  { %282 = vmatpush1.bf16.msra.mxu0 %v794_v28 }
  0x4a   :  { %283 = vmatprep.subr.bf16.mxu0 %v795_v29 }
  0x4d   :  { %284 = vmatpush1.bf16.msra.mxu0 %v797_v30 }
  0x4e   :  { %285 = vmatprep.subr.bf16.mxu0 %v798_v31 }
  0x51   :  { %286 = vmatpush1.bf16.msra.mxu0 %v800_v32 }
  0x54   :  { %288 = vmatmul.mubr.bf16.vlgmr.msra.gmra.mrb[0].mxu0 %v801_v33 }
 0x127   :  { %v922_v35 = vpop.f32.mrb[0].mxu0 }
 0x128   :  { %v924_v36 = vpop.f32.mrb[1].mxu0 }
 0x129   :  { %v926_v37 = vpop.f32.mrb[2].mxu0  ;;  %v328_v38 = vmax.f32 %v922_v35, %v924_v36 }
 0x12a   :  { %v930_v39 = vpop.f32.mrb[3].mxu0 }
 0x12b   :  { %329 = vmax.xlane.f32.xlu0 %v328_v38  ;;  %v331_v40 = vmax.f32 %v926_v37, %v930_v39 }
 0x12f   :  { %332 = vmax.xlane.f32.xlu0 %v331_v40 }
 0x15c   :  { %392 = vxpose.xlu0.b32.start.end [1/1] (short) (narrow) %v387_v43, 8  ;;  %v449_v43 = vld [vmem:[#allocation5 + $0x1] sm:$0x1] }
 0x185   :  { %751 = vset.pattern.permute.xlu0 %v873_v42 }
 0x1b8   :  { %v330_v45 = vpop.xlane.xlu0 %329 }
 0x1b9   :  { %v942_v46 = vmax.f32 %v939_v44, %v330_v45 }
 0x1bb   :  { %v340_v48 = vsub.f32 %v939_v44, %v942_v46  ;;  %381 = vst.msk [vmem:[#allocation3] sm:$0xff] %vm38_vm0, %v942_v46 }
 0x1bc   :  { %v333_v49 = vpop.xlane.xlu0 %332 }
 0x1bd   :  { %v951_v50 = vmax.f32 %v944_v47, %v333_v49  ;;  %v342_v34 = vmul.f32 1.442695, %v340_v48 }
 0x1bf   :  { %v341_v51 = vsub.f32 %v944_v47, %v951_v50  ;;  %382 = vst.msk [vmem:[#allocation3 + $0x8] sm:$0xff] %vm38_vm0, %v951_v50 }
 0x1c1   :  { %v344_v38 = vmul.f32 1.442695, %v341_v51 }
 0x1dc   :  { %v408_v52 = vpop.trf.xlu0 }
 0x1dd   :  { %425 = vperm.xlu1 %749, %v408_v52  }
 0x1e1   :  { %350 = vperm.xlu1 %749, %v942_v46  }
 0x1e5   :  { %355 = vperm.xlu1 %749, %v951_v50  }
 0x20e   :  { %482 = vxpose.xlu1.b32.start.end [1/1] (short) (narrow) %v388_v53, 8 }
 0x22c   :  { %750 = vset.pattern.permute.xlu1 %v874_v54 }
 0x22d   :  { %445 = vperm.xlu1 %750, %v408_v52  }
 0x25c   :  { %v426_v58 = vpop.permute.xlu1 %425 }
 0x25d   :  { %vm427_vm2 = vcmp.eq.s32.totalorder %v426_v58, %v964_v56  ;;  %vm428_vm3 = vcmp.eq.s32.totalorder %v426_v58, %v967_v57 }
 0x25e   :  { %v430_v59 = vsel %vm427_vm2, %v922_v35, 0.0  ;;  %v431_v60 = vsel %vm428_vm3, %v924_v36, 0.0 }
 0x25f   :  { %v432_v61 = vadd.f32 %v431_v60, %v430_v59 }
 0x260   :  { %v351_v62 = vpop.permute.xlu1 %350 }
 0x261   :  { %v358_v63 = vsub.f32 %v922_v35, %v351_v62  ;;  %v359_v0 = vsub.f32 %v924_v36, %v351_v62  ;;  %433 = vadd.xlane.f32.xlu0 %v432_v61 }
 0x263   :  { %v362_v1 = vmul.f32 1.442695, %v358_v63  ;;  %v364_v2 = vmul.f32 1.442695, %v359_v0 }
 0x264   :  { %v356_v3 = vpop.permute.xlu1 %355 }
 0x265   :  { %804 = vpow2.f32 %v362_v1  ;;  %v360_v4 = vsub.f32 %v926_v37, %v356_v3  ;;  %v361_v5 = vsub.f32 %v930_v39, %v356_v3  ;;  %v575_v1 = vld [vmem:[#allocation3] sm:$0xff] }
 0x266   :  { %806 = vpow2.f32 %v364_v2  ;;  %v520_v3 = vld [vmem:[#allocation5 + $0x4] sm:$0x1] }
 0x267   :  { %v366_v6 = vmul.f32 1.442695, %v360_v4  ;;  %v368_v7 = vmul.f32 1.442695, %v361_v5 }
 0x269   :  { %808 = vpow2.f32 %v366_v6 }
 0x26a   :  { %810 = vpow2.f32 %v368_v7  ;;  %v539_v7 = vld [vmem:[#allocation5 + $0x5] sm:$0x1] }
 0x26b   :  { %812 = vpow2.f32 %v342_v34  ;;  %v739_v34 = vld [vmem:[%s1051_s3 + $0x4] sm:$0x7] }
 0x26c   :  { %814 = vpow2.f32 %v344_v38 }
 0x26f   :  { %v805_v8 = vpop.eup %804 }
 0x270   :  { %v807_v9 = vpop.eup %806 }
 0x271   :  { %v370_v10 = vadd.f32 %v807_v9, %v805_v8 }
 0x273   :  { %v809_v11 = vpop.eup %808 }
 0x274   :  { %v811_v12 = vpop.eup %810 }
 0x275   :  { %v373_v13 = vadd.f32 %v811_v12, %v809_v11  ;;  %v813_v40 = vpop.eup %812  ;;  %v558_v11 = vld [vmem:[#allocation5 + $0x6] sm:$0x1] }
 0x276   :  { %v815_v42 = vpop.eup %814  ;;  %v346_v49 = vmul.f32 %v813_v40, %v338_v41 }
 0x28e   :  { %v498_v14 = vpop.trf.xlu1 }
 0x28f   :  { %515 = vperm.xlu0 %751, %v498_v14  }
 0x293   :  { %752 = vset.pattern.permute.xlu0 %v875_v15  ;;  %v621_v15 = vsub.s32 0, %v981_v20 }
 0x294   :  { %464 = vperm.xlu0 %752, %v408_v52  }
 0x2ac   :  { %v446_v16 = vpop.permute.xlu1 %445 }
 0x2ad   :  { %vm447_vm4 = vcmp.eq.s32.totalorder %v446_v16, %v964_v56  ;;  %vm448_vm5 = vcmp.eq.s32.totalorder %v446_v16, %v967_v57 }
 0x2ae   :  { %v450_v17 = vsel %vm447_vm4, %v922_v35, 0.0  ;;  %v451_v18 = vsel %vm448_vm5, %v924_v36, 0.0 }
 0x2af   :  { %v452_v19 = vadd.f32 %v451_v18, %v450_v17 }
 0x2b1   :  { %453 = vadd.xlane.f32.xlu1 %v452_v19  ;;  %v617_v19 = vld [vmem:[%s1051_s3] sm:$0x7] }
 0x2b3   :  { %371 = vadd.xlane.f32.xlu0 %v370_v10 }
 0x2b5   :  { %374 = vadd.xlane.f32.xlu1 %v373_v13 }
 0x2c6   :  { %535 = vperm.xlu1 %750, %v498_v14  }
 0x2c9   :  { %554 = vperm.xlu0 %752, %v498_v14  }
 0x2ee   :  { %v434_v22 = vpop.xlane.xlu0 %433 }
 0x2ef   :  { %v439_v24 = vrot.slane %v434_v22, %v985_v21 }
 0x2f1   :  { %v441_v25 = vadd.f32 %v439_v24, %v429_v23 }
 0x2f3   :  { %443 = vst.msk [vmem:[#allocation5] sm:$0x1] %vm442_vm6, %v441_v25 }
 0x30e   :  { %v516_v26 = vpop.permute.xlu0 %515 }
 0x30f   :  { %vm517_vm7 = vcmp.eq.s32.totalorder %v516_v26, %v964_v56  ;;  %vm518_vm8 = vcmp.eq.s32.totalorder %v516_v26, %v967_v57 }
 0x310   :  { %v521_v27 = vsel %vm517_vm7, %v926_v37, 0.0  ;;  %v522_v28 = vsel %vm518_vm8, %v930_v39, 0.0 }
 0x311   :  { %v523_v29 = vadd.f32 %v522_v28, %v521_v27  ;;  %v576_v28 = vld [vmem:[#allocation3 + $0x8] sm:$0xff] }
 0x313   :  { %v465_v30 = vpop.permute.xlu0 %464  ;;  %524 = vadd.xlane.f32.xlu1 %v523_v29 }
 0x314   :  { %vm466_vm9 = vcmp.eq.s32.totalorder %v465_v30, %v964_v56  ;;  %vm467_vm10 = vcmp.eq.s32.totalorder %v465_v30, %v967_v57 }
 0x315   :  { %v469_v31 = vsel %vm466_vm9, %v922_v35, 0.0  ;;  %v470_v32 = vsel %vm467_vm10, %v924_v36, 0.0  ;;  %v339_v35 = vld [vmem:[#allocation4 + $0x8] sm:$0xff] }
 0x316   :  { %v471_v33 = vadd.f32 %v470_v32, %v469_v31  ;;  %v347_v44 = vmul.f32 %v815_v42, %v339_v35 }
 0x318   :  { %472 = vadd.xlane.f32.xlu0 %v471_v33 }
 0x33e   :  { %v454_v45 = vpop.xlane.xlu1 %453 }
 0x33f   :  { %v459_v36 = vrot.slane %v454_v45, %v985_v21 }
 0x340   :  { %v372_v52 = vpop.xlane.xlu0 %371 }
 0x341   :  { %v461_v53 = vadd.f32 %v459_v36, %v449_v43  ;;  %v376_v54 = vadd.f32 %v372_v52, %v346_v49 }
 0x342   :  { %v375_v46 = vpop.xlane.xlu1 %374 }
 0x343   :  { %462 = vst.msk [vmem:[#allocation5 + $0x1] sm:$0x1] %vm442_vm6, %v461_v53  ;;  %v377_v47 = vadd.f32 %v375_v46, %v347_v44 }
 0x344   :  { %379 = vst.msk [vmem:[#allocation4] sm:$0xff] %vm38_vm0, %v376_v54 }
 0x345   :  { %380 = vst.msk [vmem:[#allocation4 + $0x8] sm:$0xff] %vm38_vm0, %v377_v47 }
 0x346   :  { %v536_v48 = vpop.permute.xlu1 %535 }
 0x347   :  { %vm537_vm11 = vcmp.eq.s32.totalorder %v536_v48, %v964_v56  ;;  %vm538_vm12 = vcmp.eq.s32.totalorder %v536_v48, %v967_v57 }
 0x348   :  { %v555_v50 = vpop.permute.xlu0 %554  ;;  %v540_v51 = vsel %vm537_vm11, %v926_v37, 0.0  ;;  %v541_v55 = vsel %vm538_vm12, %v930_v39, 0.0 }
 0x349   :  { %vm556_vm13 = vcmp.eq.s32.totalorder %v555_v50, %v964_v56  ;;  %vm557_vm14 = vcmp.eq.s32.totalorder %v555_v50, %v967_v57  ;;  %v542_v58 = vadd.f32 %v541_v55, %v540_v51 }
 0x34a   :  { %v559_v59 = vsel %vm556_vm13, %v926_v37, 0.0  ;;  %v560_v60 = vsel %vm557_vm14, %v930_v39, 0.0  ;;  %v468_v37 = vld [vmem:[#allocation5 + $0x2] sm:$0x1] }
 0x34b   :  { %543 = vadd.xlane.f32.xlu0 %v542_v58  ;;  %v561_v61 = vadd.f32 %v560_v60, %v559_v59  ;;  %v577_v62 = vld [vmem:[#allocation4] sm:$0xff] }
 0x34c   :  { %816 = vlog2.f32 %v577_v62  ;;  %v578_v25 = vld [vmem:[#allocation4 + $0x8] sm:$0xff] }
 0x34d   :  { %818 = vlog2.f32 %v578_v25 }
 0x34f   :  { %562 = vadd.xlane.f32.xlu0 %v561_v61 }
 0x356   :  { %v817_v63 = vpop.eup %816 }
 0x357   :  { %v580_v0 = vmul.f32 0.6931472, %v817_v63  ;;  %v819_v26 = vpop.eup %818 }
 0x358   :  { %v582_v27 = vmul.f32 0.6931472, %v819_v26 }
 0x359   :  { %v583_v2 = vadd.f32 %v580_v0, %v575_v1 }
 0x35a   :  { %v584_v29 = vadd.f32 %v582_v27, %v576_v28 }
 0x37c   :  { %585 = vxpose.xlu0.b32.start.end [1/1] (short) (narrow) %v583_v2, 8 }
 0x3a0   :  { %v525_v4 = vpop.xlane.xlu1 %524 }
 0x3a1   :  { %v530_v56 = vrot.slane %v525_v4, %v985_v21 }
 0x3a3   :  { %v532_v57 = vadd.f32 %v530_v56, %v520_v3 }
 0x3a5   :  { %533 = vst.msk [vmem:[#allocation5 + $0x4] sm:$0x1] %vm442_vm6, %v532_v57  ;;  %v473_v5 = vpop.xlane.xlu0 %472 }
 0x3a6   :  { %v478_v39 = vrot.slane %v473_v5, %v985_v21 }
 0x3a8   :  { %v480_v6 = vadd.f32 %v478_v39, %v468_v37 }
 0x3aa   :  { %481 = vst.msk [vmem:[#allocation5 + $0x2] sm:$0x1] %vm442_vm6, %v480_v6 }
 0x3b1   :  { %v618_v18 = vld [vmem:[#allocation5] sm:$0x7] }
 0x3d8   :  { %v544_v8 = vpop.xlane.xlu0 %543 }
 0x3d9   :  { %v549_v9 = vrot.slane %v544_v8, %v985_v21 }
 0x3db   :  { %v551_v10 = vadd.f32 %v549_v9, %v539_v7 }
 0x3dc   :  { %v563_v12 = vpop.xlane.xlu0 %562 }
 0x3dd   :  { %552 = vst.msk [vmem:[#allocation5 + $0x5] sm:$0x1] %vm442_vm6, %v551_v10  ;;  %v568_v13 = vrot.slane %v563_v12, %v985_v21 }
 0x3df   :  { %v570_v14 = vadd.f32 %v568_v13, %v558_v11 }
 0x3e1   :  { %571 = vst.msk [vmem:[#allocation5 + $0x6] sm:$0x1] %vm442_vm6, %v570_v14 }
 0x3e8   :  { %v671_v33 = vld [vmem:[#allocation5 + $0x4] sm:$0x7] }
 0x3fc   :  { %v601_v16 = vpop.trf.xlu0 }
 0x3fd   :  { %v622_v17 = vrot.slane %v601_v16, %v621_v15 }
 0x3ff   :  { %v623_v22 = vsub.f32 %v618_v18, %v622_v17 }
 0x401   :  { %v624_v23 = vmul.f32 %v623_v22, %v617_v19 }
 0x403   :  { %v626_v24 = vsel %vm43_vm1, %v624_v23, 0.0 }
 0x404   :  { %627 = vadd.xlane.f32.xlu1 %v626_v24 }
 0x437   :  { %637 = vxpose.xlu1.b32.start.end [1/1] (short) (narrow) %v584_v29, 8 }
 0x491   :  { %v628_v20 = vpop.xlane.xlu1 %627 }
 0x492   :  { %v633_v30 = vrot.slane %v628_v20, %v985_v21 }
 0x494   :  { %636 = vst.msk [vmem:[#allocation9] sm:$0x1] %vm635_vm15, %v633_v30 }
 0x4b7   :  { %v653_v31 = vpop.trf.xlu1 }
 0x4b8   :  { %v675_v32 = vrot.slane %v653_v31, %v621_v15 }
 0x4ba   :  { %v676_v38 = vsub.f32 %v671_v33, %v675_v32 }
 0x4bc   :  { %v677_v40 = vmul.f32 %v739_v34, %v676_v38 }
 0x4be   :  { %v678_v41 = vsel %vm43_vm1, %v677_v40, 0.0 }
 0x4bf   :  { %679 = vadd.xlane.f32.xlu0 %v678_v41 }
 0x54c   :  { %v680_v42 = vpop.xlane.xlu0 %679 }
 0x54d   :  { %v685_v43 = vrot.slane %v680_v42, %v985_v21 }
 0x54f   :  { %687 = vst.msk [vmem:[#allocation9 + $0x1] sm:$0x1] %vm635_vm15, %v685_v43 }
 0x550   :  { %853 = shalt.err (!%p850_p12)
}
 0x551   :  { %s854_s16 = scalar_lea.hbm %s1052_s4, 32 }
 0x552   :  { %p855_p13 = scmp.ne.s32.totalorder %s1052_s4, %s854_s16  ;;  %p858_p0 = scmp.lt.u32.totalorder %s854_s16, %s1052_s4 }
 0x554   :  { %p860_p1 = pnand %p858_p0, %p855_p13 }
 0x556   :  { %863 = shalt.err (!%p860_p1)
}
 0x557   :  { %697 = dma.vmem_to_hbm [thread:$0]  %s695_s13, 32, %s1052_s4, [#allocation8]  }
 0x558   :  { %866 = dma.done.wait [#allocation8], 32  }
 0x559   :  { %867 = vsyncadd [#allocation8], 4294967264 }
 0x55a   :  { %701 = vsyncpa [#allocation7], 1 }
 0x55b   :  { %702 = vsyncpa [#allocation8], 1 }

</bundles_post_ra>
